<compile_context>
chip_gen: v7x
topology: tpu7x:2x2x1
jax: 0.10.0
libtpu: 0.0.40
codegen_flags: <defaults>
</compile_context>

<pallas_src>
import functools

import jax
import jax.numpy as jnp
from jax.experimental import pallas as pl
from jax.experimental.pallas import tpu as pltpu

LN_EPS = 1e-5  # PyTorch nn.LayerNorm default


def _round_up(n, m):
    return ((n + m - 1) // m) * m


def mlp_head_kernel(x_ref, w1_ref, b1_ref, gamma_ref, beta_ref, w2_ref, b2_ref,
                    o_ref):
    # fc1: (TB, D) @ (D, H) on the MXU -- bf16 operands, f32 accumulation.
    h = jnp.dot(x_ref[...], w1_ref[...], preferred_element_type=jnp.float32)
    h = h + b1_ref[...]

    # SquaredReLU: relu(x)^2  (f32 on the VPU).
    h = jnp.square(jnp.maximum(h, 0.0))

    # LayerNorm over the hidden (lane) axis, one-pass statistics.
    m1 = jnp.mean(h, axis=-1, keepdims=True)
    m2 = jnp.mean(jnp.square(h), axis=-1, keepdims=True)
    var = jnp.maximum(m2 - jnp.square(m1), 0.0)
    h = (h - m1) * jax.lax.rsqrt(var + LN_EPS)
    h = h * gamma_ref[...] + beta_ref[...]

    # Dropout with p=0.0 (default head_dropout) is an identity.
    # TODO(synk): non-zero head_dropout would need pltpu.prng_* masking.

    # fc2: (TB, H) @ (H, Cp) on the MXU -- cast activations to bf16, f32 acc.
    out = jnp.dot(h.astype(w2_ref.dtype), w2_ref[...],
                  preferred_element_type=jnp.float32)
    out = out + b2_ref[...]
    o_ref[...] = out.astype(o_ref.dtype)


@functools.partial(jax.jit, static_argnames=("block_b",))
def mlp_head(x, w1, b1, gamma, beta, w2, b2, *, block_b=128):
    B, D = x.shape
    H = w1.shape[1]
    C = w2.shape[1]

    # Lane-pad the class dim to a multiple of 128 so the output block is
    # lane-dense (the MXU pads N internally anyway); slice it off at the end.
    Cp = _round_up(C, 128)

    # Batch tile: as large as requested (multiple of 16 so bf16 blocks respect
    # the (16, 128) packing), but small enough to expose >= 2 grid steps for
    # the v7x megacore when the batch allows it.
    bb = _round_up(min(block_b, _round_up(B, 16)), 16)
    if B > 16 and pl.cdiv(B, bb) < 2:
        bb = _round_up(pl.cdiv(B, 2), 16)
    Bp = _round_up(B, bb)
    grid = (Bp // bb,)

    # bf16 matmul operands (MXU-native, halves weight/activation HBM traffic);
    # biases and LN affine params stay in f32.
    xp = jnp.pad(x.astype(jnp.bfloat16), ((0, Bp - B), (0, 0)))
    w1b = w1.astype(jnp.bfloat16)
    w2b = jnp.pad(w2.astype(jnp.bfloat16), ((0, 0), (0, Cp - C)))
    b1_2d = b1.astype(jnp.float32).reshape(1, H)
    gamma_2d = gamma.astype(jnp.float32).reshape(1, H)
    beta_2d = beta.astype(jnp.float32).reshape(1, H)
    b2_2d = jnp.pad(b2.astype(jnp.float32), (0, Cp - C)).reshape(1, Cp)

    # TODO(synk): for large D*H that no longer fits double-buffered in VMEM
    # (esp. v7x 64 MiB), add a K-grid reduction axis for fc1 (W1 tiled (tk, H),
    # accumulate into VMEM scratch, mark the axis "arbitrary").
    out = pl.pallas_call(
        mlp_head_kernel,
        out_shape=jax.ShapeDtypeStruct((Bp, Cp), x.dtype),
        grid_spec=pltpu.PrefetchScalarGridSpec(
            num_scalar_prefetch=0,
            grid=grid,
            in_specs=[
                pl.BlockSpec((bb, D), lambda i: (i, 0)),    # x tile (bf16)
                pl.BlockSpec((D, H), lambda i: (0, 0)),     # W1 (full, bf16)
                pl.BlockSpec((1, H), lambda i: (0, 0)),     # b1
                pl.BlockSpec((1, H), lambda i: (0, 0)),     # LN gamma
                pl.BlockSpec((1, H), lambda i: (0, 0)),     # LN beta
                pl.BlockSpec((H, Cp), lambda i: (0, 0)),    # W2 (full, bf16)
                pl.BlockSpec((1, Cp), lambda i: (0, 0)),    # b2
            ],
            out_specs=pl.BlockSpec((bb, Cp), lambda i: (i, 0)),
        ),
        compiler_params=pltpu.CompilerParams(
            dimension_semantics=("parallel",),
            vmem_limit_bytes=32 * 1024 * 1024,
        ),
    )(xp, w1b, b1_2d, gamma_2d, beta_2d, w2b, b2_2d)

    return out[:B, :C]


def init_params(key, dim, num_classes=129, mlp_ratio=4):
    hidden = int(mlp_ratio * dim)
    k1, k2, k3, k4 = jax.random.split(key, 4)
    # Deterministic synthetic params (roughly PyTorch Linear-style scaling).
    w1 = jax.random.uniform(k1, (dim, hidden), jnp.float32,
                            -1.0, 1.0) / jnp.sqrt(dim)
    b1 = jax.random.uniform(k2, (hidden,), jnp.float32,
                            -1.0, 1.0) / jnp.sqrt(dim)
    gamma = jnp.ones((hidden,), jnp.float32)
    beta = jnp.zeros((hidden,), jnp.float32)
    w2 = jax.random.uniform(k3, (hidden, num_classes), jnp.float32,
                            -1.0, 1.0) / jnp.sqrt(hidden)
    b2 = jax.random.uniform(k4, (num_classes,), jnp.float32,
                            -1.0, 1.0) / jnp.sqrt(hidden)
    return w1, b1, gamma, beta, w2, b2


def reference(x, w1, b1, gamma, beta, w2, b2):
    # Mirrors the kernel's mixed precision: bf16 matmul operands, f32 math.
    h = jnp.dot(x.astype(jnp.bfloat16), w1.astype(jnp.bfloat16),
                preferred_element_type=jnp.float32) + b1
    h = jnp.square(jnp.maximum(h, 0.0))
    mean = jnp.mean(h, axis=-1, keepdims=True)
    var = jnp.mean(jnp.square(h - mean), axis=-1, keepdims=True)
    h = (h - mean) * jax.lax.rsqrt(var + LN_EPS)
    h = h * gamma + beta
    return jnp.dot(h.astype(jnp.bfloat16), w2.astype(jnp.bfloat16),
                   preferred_element_type=jnp.float32) + b2


if __name__ == "__main__":
    key = jax.random.PRNGKey(0)
    kx, kp = jax.random.split(key)

    batch, dim, num_classes = 32, 32, 129   # hidden = 4 * 32 = 128
    x = jax.random.normal(kx, (batch, dim), jnp.float32)
    params = init_params(kp, dim, num_classes=num_classes, mlp_ratio=4)

    out = mlp_head(x, *params)
    out = jax.block_until_ready(out)

    ref = reference(x, *params)
    assert out.shape == (batch, num_classes), out.shape
    max_err = float(jnp.max(jnp.abs(out - ref)))
    assert jnp.allclose(out, ref, atol=2e-3, rtol=2e-3), max_err

    print("KERNEL_OK")
</pallas_src>

<mosaic_0001>
module attributes {stable_mosaic.version = 11 : i64} {
  func.func @mlp_head_kernel(%arg0: i32, %arg1: memref<16x32xbf16, #tpu.memory_space<vmem>>, %arg2: memref<32x128xbf16, #tpu.memory_space<vmem>>, %arg3: memref<1x128xf32, #tpu.memory_space<vmem>>, %arg4: memref<1x128xf32, #tpu.memory_space<vmem>>, %arg5: memref<1x128xf32, #tpu.memory_space<vmem>>, %arg6: memref<128x256xbf16, #tpu.memory_space<vmem>>, %arg7: memref<1x256xf32, #tpu.memory_space<vmem>>, %arg8: memref<16x256xf32, #tpu.memory_space<vmem>>) attributes {dimension_semantics = [#tpu.dimension_semantics<parallel>], iteration_bounds = array<i64: 2>, scalar_prefetch = 0 : i64, scratch_operands = 0 : i64, tpu.core_type = #tpu.core_type<tc>, window_params = [{transform_indices = @transform_0, window_bounds = array<i64: 16, 32>}, {pipeline_mode = #tpu.pipeline_mode<synchronous>, transform_indices = @transform_1, window_bounds = array<i64: 32, 128>}, {pipeline_mode = #tpu.pipeline_mode<synchronous>, transform_indices = @transform_2, window_bounds = array<i64: 1, 128>}, {pipeline_mode = #tpu.pipeline_mode<synchronous>, transform_indices = @transform_3, window_bounds = array<i64: 1, 128>}, {pipeline_mode = #tpu.pipeline_mode<synchronous>, transform_indices = @transform_4, window_bounds = array<i64: 1, 128>}, {pipeline_mode = #tpu.pipeline_mode<synchronous>, transform_indices = @transform_5, window_bounds = array<i64: 128, 256>}, {pipeline_mode = #tpu.pipeline_mode<synchronous>, transform_indices = @transform_6, window_bounds = array<i64: 1, 256>}, {transform_indices = @transform_7, window_bounds = array<i64: 16, 256>}]} {
    %c0 = arith.constant 0 : index
    %c0_0 = arith.constant 0 : index
    %0 = vector.load %arg1[%c0, %c0_0] : memref<16x32xbf16, #tpu.memory_space<vmem>>, vector<16x32xbf16>
    %c0_1 = arith.constant 0 : index
    %c0_2 = arith.constant 0 : index
    %1 = vector.load %arg2[%c0_1, %c0_2] : memref<32x128xbf16, #tpu.memory_space<vmem>>, vector<32x128xbf16>
    %cst = arith.constant dense<0.000000e+00> : vector<16x128xf32>
    %2 = tpu.matmul %0, %1, %cst {dimension_numbers = #tpu.dot_dimension_numbers<[1], [0], [0], [1], [0, 0, 1, 1], [], []>} : vector<16x32xbf16>, vector<32x128xbf16>, vector<16x128xf32> -> vector<16x128xf32>
    %c0_3 = arith.constant 0 : index
    %c0_4 = arith.constant 0 : index
    %3 = vector.load %arg3[%c0_3, %c0_4] : memref<1x128xf32, #tpu.memory_space<vmem>>, vector<1x128xf32>
    %4 = vector.broadcast %3 : vector<1x128xf32> to vector<16x128xf32>
    %5 = arith.addf %2, %4 : vector<16x128xf32>
    %cst_5 = arith.constant 0.000000e+00 : f32
    %6 = vector.broadcast %cst_5 : f32 to vector<16x128xf32>
    %7 = arith.maximumf %5, %6 : vector<16x128xf32>
    %8 = arith.mulf %7, %7 : vector<16x128xf32>
    %cst_6 = arith.constant dense<0.000000e+00> : vector<16xf32>
    %9 = vector.multi_reduction <add>, %8, %cst_6 [1] : vector<16x128xf32> to vector<16xf32>
    %10 = vector.shape_cast %9 : vector<16xf32> to vector<16x1xf32>
    %cst_7 = arith.constant 1.280000e+02 : f32
    %11 = vector.broadcast %cst_7 : f32 to vector<16x1xf32>
    %12 = arith.divf %10, %11 : vector<16x1xf32>
    %13 = arith.mulf %8, %8 : vector<16x128xf32>
    %cst_8 = arith.constant dense<0.000000e+00> : vector<16xf32>
    %14 = vector.multi_reduction <add>, %13, %cst_8 [1] : vector<16x128xf32> to vector<16xf32>
    %15 = vector.shape_cast %14 : vector<16xf32> to vector<16x1xf32>
    %cst_9 = arith.constant 1.280000e+02 : f32
    %16 = vector.broadcast %cst_9 : f32 to vector<16x1xf32>
    %17 = arith.divf %15, %16 : vector<16x1xf32>
    %18 = arith.mulf %12, %12 : vector<16x1xf32>
    %19 = arith.subf %17, %18 : vector<16x1xf32>
    %cst_10 = arith.constant 0.000000e+00 : f32
    %20 = vector.broadcast %cst_10 : f32 to vector<16x1xf32>
    %21 = arith.maximumf %19, %20 : vector<16x1xf32>
    %22 = vector.broadcast %12 : vector<16x1xf32> to vector<16x128xf32>
    %23 = arith.subf %8, %22 : vector<16x128xf32>
    %cst_11 = arith.constant 9.99999974E-6 : f32
    %24 = vector.broadcast %cst_11 : f32 to vector<16x1xf32>
    %25 = arith.addf %21, %24 : vector<16x1xf32>
    %26 = math.rsqrt %25 : vector<16x1xf32>
    %27 = vector.broadcast %26 : vector<16x1xf32> to vector<16x128xf32>
    %28 = arith.mulf %23, %27 : vector<16x128xf32>
    %c0_12 = arith.constant 0 : index
    %c0_13 = arith.constant 0 : index
    %29 = vector.load %arg4[%c0_12, %c0_13] : memref<1x128xf32, #tpu.memory_space<vmem>>, vector<1x128xf32>
    %30 = vector.broadcast %29 : vector<1x128xf32> to vector<16x128xf32>
    %31 = arith.mulf %28, %30 : vector<16x128xf32>
    %c0_14 = arith.constant 0 : index
    %c0_15 = arith.constant 0 : index
    %32 = vector.load %arg5[%c0_14, %c0_15] : memref<1x128xf32, #tpu.memory_space<vmem>>, vector<1x128xf32>
    %33 = vector.broadcast %32 : vector<1x128xf32> to vector<16x128xf32>
    %34 = arith.addf %31, %33 : vector<16x128xf32>
    %35 = arith.truncf %34 : vector<16x128xf32> to vector<16x128xbf16>
    %c0_16 = arith.constant 0 : index
    %c0_17 = arith.constant 0 : index
    %36 = vector.load %arg6[%c0_16, %c0_17] : memref<128x256xbf16, #tpu.memory_space<vmem>>, vector<128x256xbf16>
    %cst_18 = arith.constant dense<0.000000e+00> : vector<16x256xf32>
    %37 = tpu.matmul %35, %36, %cst_18 {dimension_numbers = #tpu.dot_dimension_numbers<[1], [0], [0], [1], [0, 0, 1, 1], [], []>} : vector<16x128xbf16>, vector<128x256xbf16>, vector<16x256xf32> -> vector<16x256xf32>
    %c0_19 = arith.constant 0 : index
    %c0_20 = arith.constant 0 : index
    %38 = vector.load %arg7[%c0_19, %c0_20] : memref<1x256xf32, #tpu.memory_space<vmem>>, vector<1x256xf32>
    %39 = vector.broadcast %38 : vector<1x256xf32> to vector<16x256xf32>
    %40 = arith.addf %37, %39 : vector<16x256xf32>
    %c0_21 = arith.constant 0 : index
    %c0_22 = arith.constant 0 : index
    %41 = vector.load %arg8[%c0_21, %c0_22] : memref<16x256xf32, #tpu.memory_space<vmem>>, vector<16x256xf32>
    tpu.vector_store %arg8[%c0_21, %c0_22], %40 {strides = array<i32>} : memref<16x256xf32, #tpu.memory_space<vmem>>, vector<16x256xf32>,
    return
  }
  func.func @transform_0(%arg0: i32) -> (i32, i32) {
    %c0_i32 = arith.constant 0 : i32
    %c0_i32_0 = arith.constant 0 : i32
    return %arg0, %c0_i32 : i32, i32
  }
  func.func @transform_1(%arg0: i32) -> (i32, i32) {
    %c0_i32 = arith.constant 0 : i32
    %c0_i32_0 = arith.constant 0 : i32
    %c0_i32_1 = arith.constant 0 : i32
    return %c0_i32, %c0_i32_0 : i32, i32
  }
  func.func @transform_2(%arg0: i32) -> (i32, i32) {
    %c0_i32 = arith.constant 0 : i32
    %c0_i32_0 = arith.constant 0 : i32
    %c0_i32_1 = arith.constant 0 : i32
    return %c0_i32, %c0_i32_0 : i32, i32
  }
  func.func @transform_3(%arg0: i32) -> (i32, i32) {
    %c0_i32 = arith.constant 0 : i32
    %c0_i32_0 = arith.constant 0 : i32
    %c0_i32_1 = arith.constant 0 : i32
    return %c0_i32, %c0_i32_0 : i32, i32
  }
  func.func @transform_4(%arg0: i32) -> (i32, i32) {
    %c0_i32 = arith.constant 0 : i32
    %c0_i32_0 = arith.constant 0 : i32
    %c0_i32_1 = arith.constant 0 : i32
    return %c0_i32, %c0_i32_0 : i32, i32
  }
  func.func @transform_5(%arg0: i32) -> (i32, i32) {
    %c0_i32 = arith.constant 0 : i32
    %c0_i32_0 = arith.constant 0 : i32
    %c0_i32_1 = arith.constant 0 : i32
    return %c0_i32, %c0_i32_0 : i32, i32
  }
  func.func @transform_6(%arg0: i32) -> (i32, i32) {
    %c0_i32 = arith.constant 0 : i32
    %c0_i32_0 = arith.constant 0 : i32
    %c0_i32_1 = arith.constant 0 : i32
    return %c0_i32, %c0_i32_0 : i32, i32
  }
  func.func @transform_7(%arg0: i32) -> (i32, i32) {
    %c0_i32 = arith.constant 0 : i32
    %c0_i32_0 = arith.constant 0 : i32
    return %arg0, %c0_i32 : i32, i32
  }
}

</mosaic_0001>

<bundles_post_ra>
// kernel: mlp_head.1
= control target key start
LH: loop header
LB: loop body
LE: loop exit
PB: predicated region body
PF: predicated region fallthrough
CT: control target
= control target key end

     0   :  { %12 = vsyncpa [#allocation3], 0  ;;  %s1054_s0 = inlined_call_operand.vmem [shape: bf16[32,32], index: 0, kind: input, shape index: {}]   ;;  %s1055_s1 = inlined_call_operand.vmem [shape: bf16[32,128], index: 1, kind: input, shape index: {}]   ;;  %s1056_s2 = inlined_call_operand.vmem [shape: f32[1,128], index: 2, kind: input, shape index: {}]   ;;  %s1057_s3 = inlined_call_operand.vmem [shape: f32[1,128], index: 3, kind: input, shape index: {}]   ;;  %s1058_s4 = inlined_call_operand.vmem [shape: f32[1,128], index: 4, kind: input, shape index: {}]   ;;  %s1059_s5 = inlined_call_operand.vmem [shape: bf16[128,256], index: 5, kind: input, shape index: {}]   ;;  %s1060_s6 = inlined_call_operand.vmem [shape: f32[1,256], index: 6, kind: input, shape index: {}]   ;;  %s1061_s7 = inlined_call_operand.hbm [shape: f32[32,256], index: 7, kind: output, shape index: {}]  }
   0x1   :  { %14 = vsyncpa [#allocation3 + $0x1], 0  ;;  %s874_s24 = smov 0   ;;  %s876_s25 = smov 0  }
   0x2   :  { %s878_s26 = smov 0   ;;  %s880_s27 = smov 0  }
   0x3 LB: > { %s895_s28 = sadd.s32 4294967295, %s826_s27   ;;  %s640_s29 = sadd.s32 4294967294, %s826_s27   ;;  %s826_s27 = sphi %s880_s27, %s1067_s27   ;;  %s822_s26 = sphi %s878_s26, %s1066_s26   ;;  %s818_s25 = sphi %s876_s25, %s1065_s25   ;;  %s814_s24 = sphi %s874_s24, %s1064_s24  }
   0x4   : > { %s899_s30 = sadd.s32 1, %s826_s27   ;;  %s179_s8 = sadd.s32 1, %s822_s26 }
   0x5   : > { %s176_s9 = ssub.s32 %s826_s27, %s899_s30  ;;  %p189_p0 = scmp.ne.s32.totalorder %s822_s26, %s818_s25 }
   0x6   : > { %p177_p1 = scmp.eq.s32.totalorder %s176_s9, 0  ;;  %p190_p2 = scmp.eq.s32.totalorder %s895_s28, 1 }
   0x7   : > { %p195_p3 = scmp.ne.s32.totalorder %s818_s25, %s814_s24  ;;  %p196_p4 = scmp.eq.s32.totalorder %s640_s29, 1 }
   0x8   : > { %s910_s10 = scalar_select %p177_p1, %s822_s26, %s179_s8  }
   0x9   : > { %p912_p5 = por %p190_p2, %p189_p0  ;;  %p916_p6 = por %p196_p4, %p195_p3 }
   0xa   : > { %p643_p7 = scmp.ge.s32.totalorder %s826_s27, 1  ;;  %p241_p8 = scmp.lt.s32.totalorder %s826_s27, 3 }
   0xc   : > { %p242_p9 = pnand %p643_p7, %p241_p8 }
   0xd   : > { %v733_v0 = vld [vmem:[%s1055_s1] sm:$0xff] (!%p242_p9)   ;;  %v828_v1 = vmov (!%p242_p9), 0.0   ;;  %v734_v2 = vld [vmem:[%s1055_s1 + $0x8] sm:$0xff] (!%p242_p9)   ;;  %vm829_vm0 = vmmov (!%p242_p9), 0   ;;  %s645_s17 = sshll.u32 (!%p242_p9), %s895_s28, 1  ;;  %vm311_vm1 = vcmask (!%p242_p9), 261120   ;;  %v426_v63 = vlaneseq (!%p242_p9) }
   0xe   : > { %245 = sbr.rel (%p242_p9) target bundleno = 650 (0x28a), region = 48  ;;  %681 = vmatprep.subr.bf16.mxu0 (!%p242_p9), %v828_v1  ;;  %685 = vmatprep.mubr.msk.bf16.mxu0 (!%p242_p9), %vm829_vm0, %v828_v1  ;;  %p274_p10 = scmp.lt.s32.totalorder (!%p242_p9), %s645_s17, 3  ;;  %v647_v4 = vld [vmem:[%s1056_s2] ss:$0 sm:$0xff] (!%p242_p9)  ;;  %v736_v17 = vld [vmem:[%s1059_s5 + $0x4] ss:$8 sps:$4 sm:$0xff] (!%p242_p9)  }
   0xf   : > { %682 = vmatpush3.bf16.msra.mxu0 (!%p242_p9), %v733_v0  ;;  %v738_v18 = vld [vmem:[%s1059_s5] ss:$8 sps:$4 sm:$0xff] (!%p242_p9)   ;;  %516 = vmatprep.subr.bf16.mxu1 (!%p242_p9), %v736_v17  ;;  %v739_v19 = vld [vmem:[%s1059_s5 + $0x14] ss:$8 sps:$4 sm:$0xff] (!%p242_p9)   ;;  %v741_v20 = vld [vmem:[%s1059_s5 + $0x10] ss:$8 sps:$4 sm:$0xff] (!%p242_p9)  }
  0x10   : > { %683 = vmatprep.subr.bf16.mxu0 (!%p242_p9), %v828_v1  ;;  %517 = vmatpush1.bf16.msra.mxu1 (!%p242_p9), %v738_v18  ;;  %v742_v21 = vld [vmem:[%s1059_s5 + $0x24] ss:$8 sps:$4 sm:$0xff] (!%p242_p9)   ;;  %v744_v22 = vld [vmem:[%s1059_s5 + $0x20] ss:$8 sps:$4 sm:$0xff] (!%p242_p9)   ;;  %v745_v23 = vld [vmem:[%s1059_s5 + $0x34] ss:$8 sps:$4 sm:$0xff] (!%p242_p9)  }
  0x11   : > { %518 = vmatprep.subr.bf16.mxu1 (!%p242_p9), %v739_v19  ;;  %v747_v24 = vld [vmem:[%s1059_s5 + $0x30] ss:$8 sps:$4 sm:$0xff] (!%p242_p9)   ;;  %v748_v25 = vld [vmem:[%s1059_s5 + $0x44] ss:$8 sps:$4 sm:$0xff] (!%p242_p9)   ;;  %v750_v26 = vld [vmem:[%s1059_s5 + $0x40] ss:$8 sps:$4 sm:$0xff] (!%p242_p9)  }
  0x12   : > { %v751_v27 = vld [vmem:[%s1059_s5 + $0x54] ss:$8 sps:$4 sm:$0xff] (!%p242_p9)   ;;  %v830_v28 = vmov (!%p242_p9), 0   ;;  %v753_v29 = vld [vmem:[%s1059_s5 + $0x50] ss:$8 sps:$4 sm:$0xff] (!%p242_p9)   ;;  %v427_v0 = vshrl.u32 (!%p242_p9), %v426_v63, 7 }
  0x13   : > { %684 = vmatpush3.bf16.msra.mxu0 (!%p242_p9), %v734_v2  ;;  %548 = vmatprep.mubr.bf16.mxu1 (!%p242_p9), %v830_v28  ;;  %v754_v30 = vld [vmem:[%s1059_s5 + $0x64] ss:$8 sps:$4 sm:$0xff] (!%p242_p9)   ;;  %v756_v31 = vld [vmem:[%s1059_s5 + $0x60] ss:$8 sps:$4 sm:$0xff] (!%p242_p9)   ;;  %v757_v32 = vld [vmem:[%s1059_s5 + $0x74] ss:$8 sps:$4 sm:$0xff] (!%p242_p9)  }
  0x14   : > { %519 = vmatpush1.bf16.msra.mxu1 (!%p242_p9), %v741_v20  ;;  %v759_v33 = vld [vmem:[%s1059_s5 + $0x70] ss:$8 sps:$4 sm:$0xff] (!%p242_p9)   ;;  %v652_v53 = vld [vmem:[%s1057_s3] ss:$0 sm:$0xff] (!%p242_p9)  ;;  %v428_v1 = vsub.s32 (!%p242_p9), 0, %v427_v0  ;;  %s677_s29 = sshll.u32 (!%p242_p9), %s895_s28, 9 }
  0x15   : > { %s1069_s17 = smov (!%p274_p10, %s645_s17), 3  ;;  %520 = vmatprep.subr.bf16.mxu1 %v742_v21  ;;  %v653_v58 = vld [vmem:[%s1058_s4] ss:$0 sm:$0xff]  ;;  %s1011_s13 = scalar_lea.hbm %s1061_s7, %s677_s29 }
  0x16   : > { %s646_s18 = sshll.u32 %s1069_s17, 2  ;;  %v424_v2 = vld [vmem:[%s1060_s6] sm:$0x3]  ;;  %s831_s15 = smov [#allocation2]  }
  0x17   : > { %s277_s21 = scalar_lea.vmem %s1054_s0, %s646_s18  ;;  %s270_s18 = sand.u32 1, %s818_s25  }
  0x18   : > { %v735_v3 = vld [vmem:[%s277_s21] sm:$0xff]   ;;  %521 = vmatpush1.bf16.msra.mxu1 %v744_v22  ;;  %s644_s21 = sshll.u32 %s270_s18, 5  ;;  %s1013_s28 = scalar_lea.sflag [#allocation3], %s270_s18 }
  0x19   : > { %686 = vmatmul.mubr.msk.bf16.vlgmr.msra.gmra.mrb[0].mxu0 %vm311_vm1, %v735_v3  ;;  %522 = vmatprep.subr.bf16.mxu1 %v745_v23  ;;  %v432_v3 = vsub.s32 1, %v427_v0  ;;  %s272_s22 = scalar_lea.vmem [#allocation2], %s644_s21  ;;  %s768_s16 = sshll.u32 %s831_s15, 4  ;;  %s769_s16 = int_to_ptr.vmem [resolvable:$false] %s768_s16 }
  0x1a   : > { %s578_s23 = sshll.u32 %s272_s22, 4  ;;  %s770_s17 = scalar_lea.vmem %s769_s16, 1024  ;;  %s1006_s23 = int_to_ptr.vmem [resolvable:$true] %s578_s23 }
  0x1b   : > { %s764_s14 = scalar_lea.vmem %s1006_s23, 512  ;;  %p771_p0 = scmp.lt.s32.totalorder %s1006_s23, %s769_s16 }
  0x1c   : > { %523 = vmatpush1.bf16.msra.mxu1 %v747_v24  ;;  %p765_p11 = scmp.ne.s32.totalorder %s1006_s23, %s764_s14  ;;  %p772_p1 = scmp.lt.s32.totalorder %s770_s17, %s764_s14 }
  0x1d   : > { %524 = vmatprep.subr.bf16.mxu1 %v748_v25 }
  0x1e   : > { %p766_p12 = pnand %p765_p11, %p912_p5  ;;  %p773_p2 = por %p772_p1, %p771_p0 }
  0x20   : > { %525 = vmatpush1.bf16.msra.mxu1 %v750_v26  ;;  %p767_p13 = pneg %p766_p12 }
  0x21   : > { %526 = vmatprep.subr.bf16.mxu1 %v751_v27 }
  0x22   : > { %p774_p3 = pnand %p773_p2, %p767_p13 }
  0x24   : > { %527 = vmatpush1.bf16.msra.mxu1 %v753_v29 }
  0x25   : > { %528 = vmatprep.subr.bf16.mxu1 %v754_v30 }
  0x28   : > { %529 = vmatpush1.bf16.msra.mxu1 %v756_v31 }
  0x29   : > { %530 = vmatprep.subr.bf16.mxu1 %v757_v32 }
  0x2c   : > { %531 = vmatpush1.bf16.msra.mxu1 %v759_v33 }
  0xec   : > { %v349_v5 = vpop.f32.mrb[0].mxu0 }
  0xed   : > { %v350_v6 = vadd.f32 %v647_v4, %v349_v5  ;;  %v687_v7 = vpop.f32.mrb[1].mxu0  ;;  %v433_v5 = vrot.slane %v424_v2, %v432_v3 }
  0xee   : > { %v352_v8 = vpop.f32.mrb[2].mxu0 }
  0xef   : > { %v356_v9 = vmax.f32 %v350_v6, 0.0  ;;  %v353_v10 = vadd.f32 %v647_v4, %v352_v8  ;;  %v688_v11 = vpop.f32.mrb[3].mxu0  ;;  %v429_v4 = vrot.slane %v424_v2, %v428_v1 }
  0xf1   : > { %v935_v12 = vmul.f32 %v356_v9, %v356_v9  ;;  %v357_v13 = vmax.f32 %v353_v10, 0.0 }
  0xf3   : > { %v937_v14 = vmul.f32 %v357_v13, %v357_v13  ;;  %360 = vadd.xlane.f32.xlu0 %v935_v12  ;;  %v367_v15 = vmul.f32 %v935_v12, %v935_v12 }
  0xf5   : > { %369 = vadd.xlane.f32.xlu1 %v367_v15  ;;  %v368_v16 = vmul.f32 %v937_v14, %v937_v14 }
  0xf7   : > { %362 = vadd.xlane.f32.xlu0 %v937_v14 }
  0xf9   : > { %371 = vadd.xlane.f32.xlu1 %v368_v16 }
 0x180   : > { %v361_v34 = vpop.xlane.xlu0 %360 }
 0x181   : > { %v365_v35 = vmul.f32 0.0078125, %v361_v34 }
 0x182   : > { %v370_v36 = vpop.xlane.xlu1 %369 }
 0x183   : > { %v375_v37 = vmul.f32 %v365_v35, %v365_v35  ;;  %v373_v38 = vmul.f32 0.0078125, %v370_v36  ;;  %v381_v50 = vsub.f32 %v935_v12, %v365_v35 }
 0x184   : > { %v363_v39 = vpop.xlane.xlu0 %362 }
 0x185   : > { %v377_v40 = vsub.f32 %v373_v38, %v375_v37  ;;  %v366_v41 = vmul.f32 0.0078125, %v363_v39 }
 0x186   : > { %v372_v42 = vpop.xlane.xlu1 %371 }
 0x187   : > { %v379_v43 = vmax.f32 %v377_v40, 0.0  ;;  %v376_v44 = vmul.f32 %v366_v41, %v366_v41  ;;  %v374_v45 = vmul.f32 0.0078125, %v372_v42  ;;  %v382_v54 = vsub.f32 %v937_v14, %v366_v41 }
 0x189   : > { %v383_v46 = vadd.f32 1e-05, %v379_v43  ;;  %v378_v47 = vsub.f32 %v374_v45, %v376_v44 }
 0x18b   : > { %760 = vrsqrt.f32 %v383_v46  ;;  %v380_v48 = vmax.f32 %v378_v47, 0.0 }
 0x18d   : > { %v384_v49 = vadd.f32 1e-05, %v380_v48 }
 0x18f   : > { %762 = vrsqrt.f32 %v384_v49 }
 0x195   : > { %v761_v51 = vpop.eup %760 }
 0x196   : > { %v387_v52 = vmul.f32 %v761_v51, %v381_v50 }
 0x198   : > { %v396_v57 = vmul.f32 %v652_v53, %v387_v52 }
 0x199   : > { %v763_v55 = vpop.eup %762 }
 0x19a   : > { %v388_v56 = vmul.f32 %v763_v55, %v382_v54  ;;  %v405_v60 = vadd.f32 %v653_v58, %v396_v57 }
 0x19c   : > { %v397_v59 = vmul.f32 %v652_v53, %v388_v56 }
 0x19e   : > { %v406_v61 = vadd.f32 %v653_v58, %v397_v59 }
 0x1a0   : > { %v407_v62 = vpack.c.bf16 %v406_v61, %v405_v60 }
 0x1a2   : > { %549 = vmatmul.mubr.bf16.vlgmr.msra.gmra.mrb[0].mxu1 %v407_v62 }
 0x275   : > { %v550_v6 = vpop.f32.mrb[0].mxu1 }
 0x276   : > { %v551_v7 = vadd.f32 %v550_v6, %v429_v4  ;;  %v552_v8 = vpop.f32.mrb[1].mxu1 }
 0x277   : > { %v553_v9 = vadd.f32 %v552_v8, %v433_v5  ;;  %v554_v10 = vpop.f32.mrb[2].mxu1 }
 0x278   : > { %559 = vst [vmem:[%s272_s22] sm:$0xff] %v551_v7  ;;  %v555_v11 = vadd.f32 %v554_v10, %v429_v4  ;;  %v556_v12 = vpop.f32.mrb[3].mxu1 }
 0x279   : > { %560 = vst [vmem:[%s272_s22 + $0x8] sm:$0xff] %v553_v9  ;;  %v557_v13 = vadd.f32 %v556_v12, %v433_v5 }
 0x27a   : > { %561 = vst [vmem:[%s272_s22 + $0x10] sm:$0xff] %v555_v11 }
 0x27b   : > { %562 = vst [vmem:[%s272_s22 + $0x18] sm:$0xff] %v557_v13 }
 0x27c   : > { %777 = shalt.err (!%p774_p3)
}
 0x27d   : > { %s778_s18 = scalar_lea.hbm %s1011_s13, 512  ;;  %s782_s21 = scalar_lea.hbm %s1061_s7, 1024 }
 0x27e   : > { %p779_p4 = scmp.ne.s32.totalorder %s1011_s13, %s778_s18  ;;  %p783_p9 = scmp.lt.u32.totalorder %s1011_s13, %s1061_s7 }
 0x27f   : > { %p784_p10 = scmp.lt.u32.totalorder %s782_s21, %s778_s18  ;;  %p786_p12 = scmp.lt.u32.totalorder %s778_s18, %s1011_s13 }
 0x280   : > { %p780_p7 = pnand %p779_p4, %p912_p5 }
 0x281   : > { %p785_p11 = por %p784_p10, %p783_p9 }
 0x282   : > { %p781_p8 = pneg %p780_p7 }
 0x283   : > { %p787_p13 = por %p786_p12, %p785_p11 }
 0x285   : > { %p788_p0 = pnand %p787_p13, %p781_p8 }
 0x287   : > { %791 = shalt.err (!%p788_p0)
}
 0x288   : > { %s832_s8 = smov 256   ;;  %s833_s9 = smov 16  }
 0x289   : > { %689 = dma.vmem_to_hbm [thread:$0]  (%p912_p5), %s1006_s23, 512, %s1011_s13, %s1013_s28, %s832_s8, %s832_s8, %s833_s9  }
 0x28a PF: > { %p695_p1 = scmp.ge.s32.totalorder %s826_s27, 2  ;;  %s593_s14 = sand.u32 1, %s814_s24  }
 0x28b   : > { %s594_s15 = scalar_lea.sflag [#allocation3], %s593_s14 }
 0x28c   : > { %p692_p2 = pnand %p695_p1, %p916_p6 }
 0x28e   : > { %809 = dma.done.wait (!%p692_p2), %s594_s15, 512  }
 0x28f   : > { %811 = vsyncadd (!%p692_p2), %s594_s15, 4294966784  ;;  %p17_p3 = scmp.ge.s32.totalorder %s899_s30, 4   ;;  %s1064_s24 = smov %s818_s25 }
 0x290   : > { %s1065_s25 = smov %s822_s26  ;;  %s1066_s26 = smov %s910_s10 }
 0x291   : > { %s1067_s27 = smov %s899_s30  ;;  %19 = sbr.rel (!%p17_p3) target bundleno = 3 (0x3), region = 83 }
 0x298   :  { %599 = vsyncpa [#allocation3], 1 }
 0x299   :  { %601 = vsyncpa [#allocation3 + $0x1], 1 }

</bundles_post_ra>
